<compile_context>
chip_gen: v7x
topology: tpu7x:2x2x1
jax: 0.10.0
libtpu: 0.0.40
codegen_flags: <defaults>
</compile_context>

<pallas_src>
import functools

import jax
import jax.numpy as jnp
from jax.experimental import pallas as pl
from jax.experimental.pallas import tpu as pltpu


# -----------------------------------------------------------------------------
# Fused kernel: Conv3x3(+BN)+ReLU -> Conv3x3(+BN)+ReLU for one image, VMEM-only.
# -----------------------------------------------------------------------------
def _fused_convblock_kernel(xp_ref, a1_ref, b1_ref, a2_ref, b2_ref, o_ref):
    """xp_ref : (Hp+2, (Wp+2)*Cin)   pooled + zero-padded input, compute dtype
    a1_ref : (3*(Wp+2)*Cin, Wp*Mid) banded conv1 weight (BN1 scale folded in)
    b1_ref : (1, Wp*Mid)            folded BN1 bias, tiled along W (f32)
    a2_ref : (3*Wp*Mid, Wp*Cout)    banded conv2 weight (BN2 scale folded in)
    b2_ref : (1, Wp*Cout)           folded BN2 bias, tiled along W (f32)
    o_ref  : (Hp, Wp*Cout)          f32 output (lane-dense along W*C)
    """
    hpad, _ = xp_ref.shape
    hp = hpad - 2
    wp_mid = a1_ref.shape[1]
    cdt = a1_ref.dtype

    # ---- conv1: dy taps concatenated on lanes; dx taps live in the banded A1.
    cols1 = jnp.concatenate(
        [xp_ref[dy:dy + hp, :] for dy in range(3)], axis=-1)   # (Hp, 3*(Wp+2)*Cin)
    h = jnp.dot(cols1, a1_ref[...], preferred_element_type=jnp.float32)
    h = jnp.maximum(h + b1_ref[...], 0.0)                      # folded BN1 + ReLU (f32)
    h = h.astype(cdt)                                          # operand for 2nd MXU dot

    # ---- conv2: zero rows at the H border instead of a halo scratch.
    zrow = jnp.zeros((1, wp_mid), dtype=cdt)
    cols2 = jnp.concatenate(
        [jnp.concatenate([zrow, h[:hp - 1, :]], axis=0),       # dy = 0  (row y-1)
         h,                                                    # dy = 1  (row y)
         jnp.concatenate([h[1:, :], zrow], axis=0)],           # dy = 2  (row y+1)
        axis=-1)                                               # (Hp, 3*Wp*Mid)
    y = jnp.dot(cols2, a2_ref[...], preferred_element_type=jnp.float32)
    y = jnp.maximum(y + b2_ref[...], 0.0)                      # folded BN2 + ReLU

    # Dropout(0.2) is identity in eval mode.
    o_ref[...] = y.astype(o_ref.dtype)


# -----------------------------------------------------------------------------
# Wrapper-side weight preparation
# -----------------------------------------------------------------------------
def _fold_bn(w_hwio, gamma, beta, mean, var, eps=1e-5):
    """Fold eval-mode BatchNorm into the bias-free conv (scale->weights,
    shift->bias). Returns f32 (3,3,Ci,Co) weight and (Co,) bias."""
    scale = gamma / jnp.sqrt(var + eps)
    w_eff = w_hwio * scale[None, None, None, :]
    b_eff = beta - mean * scale
    return w_eff, b_eff


def _band_weight(w, n_in, n_out, pad_in):
    """Banded block-Toeplitz matrix implementing the dx taps of a 3x3 conv.

    w: (3, 3, Ci, Co) folded conv weight, indexed [dy, dx, ci, co].
    Returns (3*n_in*Ci, n_out*Co) with row = dy*(n_in*Ci) + xi*Ci + ci and
    col = x*Co + co; value = w[dy, dx, ci, co] with dx = xi - x (input already
    W-padded) or xi - x + 1 (unpadded input); zero outside dx in {0,1,2}.
    """
    ci, co = w.shape[2], w.shape[3]
    xi = jnp.arange(n_in)[:, None]
    xo = jnp.arange(n_out)[None, :]
    dx = xi - xo if pad_in else xi - xo + 1                 # (n_in, n_out)
    valid = (dx >= 0) & (dx <= 2)
    g = w[:, jnp.clip(dx, 0, 2)]                            # (3, n_in, n_out, Ci, Co)
    g = jnp.where(valid[None, :, :, None, None], g, 0.0)
    g = jnp.transpose(g, (0, 1, 3, 2, 4))                   # (3, n_in, Ci, n_out, Co)
    return g.reshape(3 * n_in * ci, n_out * co)


def encoder_forward(params, x_nchw, compute_dtype=jnp.bfloat16):
    """Encoder: MaxPool2d(2) -> Conv3x3+BN+ReLU -> Conv3x3+BN+ReLU (eval mode)."""
    x = jnp.transpose(x_nchw, (0, 2, 3, 1)).astype(jnp.float32)   # NCHW -> NHWC
    B, H, W, Cin = x.shape
    Hp, Wp = H // 2, W // 2

    # MaxPool2d(2) + 1px halo pad as one tiny XLA fusion.
    # TODO(synk): fold into the kernel once a spatial grid axis exists.
    p = x.reshape(B, Hp, 2, Wp, 2, Cin).max(axis=(2, 4))
    xp = jnp.pad(p, ((0, 0), (1, 1), (1, 1), (0, 0)))
    # Lane-dense compute-dtype input: (B, Hp+2, (Wp+2)*Cin).
    xp2 = xp.reshape(B, Hp + 2, (Wp + 2) * Cin).astype(compute_dtype)

    w1f, b1 = _fold_bn(params["w1"], params["bn1_g"], params["bn1_b"],
                       params["bn1_m"], params["bn1_v"])
    w2f, b2 = _fold_bn(params["w2"], params["bn2_g"], params["bn2_b"],
                       params["bn2_m"], params["bn2_v"])
    Mid, Cout = w1f.shape[-1], w2f.shape[-1]

    a1 = _band_weight(w1f, Wp + 2, Wp, pad_in=True).astype(compute_dtype)
    a2 = _band_weight(w2f, Wp, Wp, pad_in=False).astype(compute_dtype)
    b1t = jnp.tile(b1, Wp)[None, :].astype(jnp.float32)          # (1, Wp*Mid)
    b2t = jnp.tile(b2, Wp)[None, :].astype(jnp.float32)          # (1, Wp*Cout)

    out3 = pl.pallas_call(
        _fused_convblock_kernel,
        out_shape=jax.ShapeDtypeStruct((B, Hp, Wp * Cout), jnp.float32),
        grid_spec=pltpu.PrefetchScalarGridSpec(
            num_scalar_prefetch=0,
            grid=(B,),
            in_specs=[
                pl.BlockSpec((None, Hp + 2, (Wp + 2) * Cin), lambda b: (b, 0, 0)),
                pl.BlockSpec((3 * (Wp + 2) * Cin, Wp * Mid), lambda b: (0, 0)),
                pl.BlockSpec((1, Wp * Mid), lambda b: (0, 0)),
                pl.BlockSpec((3 * Wp * Mid, Wp * Cout), lambda b: (0, 0)),
                pl.BlockSpec((1, Wp * Cout), lambda b: (0, 0)),
            ],
            out_specs=pl.BlockSpec((None, Hp, Wp * Cout), lambda b: (b, 0, 0)),
        ),
        compiler_params=pltpu.CompilerParams(
            dimension_semantics=("parallel",)),
    )(xp2, a1, b1t, a2, b2t)

    # (B, Hp, Wp*Cout) -> (B, Cout, Hp, Wp)  (PyTorch NCHW boundary).
    return out3.reshape(B, Hp, Wp, Cout).transpose(0, 3, 1, 2)


# -----------------------------------------------------------------------------
# Pure-JAX reference (independent path: reduce_window + lax.conv)
# -----------------------------------------------------------------------------
def encoder_forward_ref(params, x_nchw):
    x = jnp.transpose(x_nchw, (0, 2, 3, 1)).astype(jnp.float32)
    p = jax.lax.reduce_window(x, -jnp.inf, jax.lax.max,
                              (1, 2, 2, 1), (1, 2, 2, 1), "VALID")

    def conv3(inp, w):
        return jax.lax.conv_general_dilated(
            inp, w, window_strides=(1, 1), padding=((1, 1), (1, 1)),
            dimension_numbers=("NHWC", "HWIO", "NHWC"))

    def bn(y, g, b, m, v, eps=1e-5):
        s = g / jnp.sqrt(v + eps)
        return y * s.reshape(1, 1, 1, -1) + (b - m * s).reshape(1, 1, 1, -1)

    h = jnp.maximum(bn(conv3(p, params["w1"]), params["bn1_g"], params["bn1_b"],
                       params["bn1_m"], params["bn1_v"]), 0.0)
    y = jnp.maximum(bn(conv3(h, params["w2"]), params["bn2_g"], params["bn2_b"],
                       params["bn2_m"], params["bn2_v"]), 0.0)
    return jnp.transpose(y, (0, 3, 1, 2))


# -----------------------------------------------------------------------------
# Parameter init + main
# -----------------------------------------------------------------------------
def init_params(key, in_channels, out_channels):
    mid = out_channels // 2
    ks = jax.random.split(key, 10)
    n = lambda k, s: (0.1 * jax.random.normal(k, s)).astype(jnp.float32)
    return {
        # Conv2d(in, out//2, 3, pad=1, bias=False), weight as (kH, kW, Cin, Cout)
        "w1": n(ks[0], (3, 3, in_channels, mid)),
        "bn1_g": 1.0 + n(ks[1], (mid,)),
        "bn1_b": n(ks[2], (mid,)),
        "bn1_m": n(ks[3], (mid,)),
        "bn1_v": 0.5 + jnp.abs(n(ks[4], (mid,))),
        # Conv2d(out//2, out, 3, pad=1, bias=False)
        "w2": n(ks[5], (3, 3, mid, out_channels)),
        "bn2_g": 1.0 + n(ks[6], (out_channels,)),
        "bn2_b": n(ks[7], (out_channels,)),
        "bn2_m": n(ks[8], (out_channels,)),
        "bn2_v": 0.5 + jnp.abs(n(ks[9], (out_channels,))),
    }


if __name__ == "__main__":
    # Encoder(in_channels=4, out_channels=8) on a (2, 4, 16, 16) NCHW input.
    B, IN_C, OUT_C, H, W = 2, 4, 8, 16, 16
    key = jax.random.PRNGKey(0)
    kx, kp = jax.random.split(key)

    x = jax.random.normal(kx, (B, IN_C, H, W), dtype=jnp.float32)   # NCHW
    params = init_params(kp, IN_C, OUT_C)

    ref = jax.block_until_ready(encoder_forward_ref(params, x))

    # Production config: bf16 MXU operands, f32 accumulation.
    fwd_bf16 = jax.jit(functools.partial(encoder_forward, params,
                                         compute_dtype=jnp.bfloat16))
    out = jax.block_until_ready(fwd_bf16(x))
    assert out.shape == (B, OUT_C, H // 2, W // 2), out.shape
    assert jnp.allclose(out, ref, atol=5e-2, rtol=5e-2), \
        float(jnp.max(jnp.abs(out - ref)))

    # f32-operand run: tighter check of the banded-weight / tap indexing.
    # (Tolerance stays 1e-2 because default TPU matmul precision is bf16-pass
    # based on both paths; indexing bugs would show up as O(0.1-1) errors.)
    fwd_f32 = jax.jit(functools.partial(encoder_forward, params,
                                        compute_dtype=jnp.float32))
    out32 = jax.block_until_ready(fwd_f32(x))
    assert jnp.allclose(out32, ref, atol=1e-2, rtol=1e-2), \
        float(jnp.max(jnp.abs(out32 - ref)))

    print("KERNEL_OK")
</pallas_src>

<mosaic_0001>
module attributes {stable_mosaic.version = 11 : i64} {
  func.func @_fused_convblock_kernel(%arg0: i32, %arg1: memref<1x10x40xbf16, #tpu.memory_space<vmem>>, %arg2: memref<120x32xbf16, #tpu.memory_space<vmem>>, %arg3: memref<1x32xf32, #tpu.memory_space<vmem>>, %arg4: memref<96x64xbf16, #tpu.memory_space<vmem>>, %arg5: memref<1x64xf32, #tpu.memory_space<vmem>>, %arg6: memref<1x8x64xf32, #tpu.memory_space<vmem>>) attributes {dimension_semantics = [#tpu.dimension_semantics<parallel>], iteration_bounds = array<i64: 2>, scalar_prefetch = 0 : i64, scratch_operands = 0 : i64, tpu.core_type = #tpu.core_type<tc>, window_params = [{transform_indices = @transform_0, window_bounds = array<i64: 1, 10, 40>}, {pipeline_mode = #tpu.pipeline_mode<synchronous>, transform_indices = @transform_1, window_bounds = array<i64: 120, 32>}, {pipeline_mode = #tpu.pipeline_mode<synchronous>, transform_indices = @transform_2, window_bounds = array<i64: 1, 32>}, {pipeline_mode = #tpu.pipeline_mode<synchronous>, transform_indices = @transform_3, window_bounds = array<i64: 96, 64>}, {pipeline_mode = #tpu.pipeline_mode<synchronous>, transform_indices = @transform_4, window_bounds = array<i64: 1, 64>}, {transform_indices = @transform_5, window_bounds = array<i64: 1, 8, 64>}]} {
    %c0 = arith.constant 0 : index
    %c0_0 = arith.constant 0 : index
    %c0_1 = arith.constant 0 : index
    %0 = vector.load %arg1[%c0, %c0_0, %c0_1] : memref<1x10x40xbf16, #tpu.memory_space<vmem>>, vector<1x8x40xbf16>
    %1 = vector.shape_cast %0 : vector<1x8x40xbf16> to vector<8x40xbf16>
    %c0_2 = arith.constant 0 : index
    %c1 = arith.constant 1 : index
    %c0_3 = arith.constant 0 : index
    %2 = vector.load %arg1[%c0_2, %c1, %c0_3] : memref<1x10x40xbf16, #tpu.memory_space<vmem>>, vector<1x8x40xbf16>
    %3 = vector.shape_cast %2 : vector<1x8x40xbf16> to vector<8x40xbf16>
    %c0_4 = arith.constant 0 : index
    %c2 = arith.constant 2 : index
    %c0_5 = arith.constant 0 : index
    %4 = vector.load %arg1[%c0_4, %c2, %c0_5] : memref<1x10x40xbf16, #tpu.memory_space<vmem>>, vector<1x8x40xbf16>
    %5 = vector.shape_cast %4 : vector<1x8x40xbf16> to vector<8x40xbf16>
    %6 = tpu.concatenate %1, %3, %5 in 1 : vector<8x40xbf16>, vector<8x40xbf16>, vector<8x40xbf16> -> vector<8x120xbf16>
    %c0_6 = arith.constant 0 : index
    %c0_7 = arith.constant 0 : index
    %7 = vector.load %arg2[%c0_6, %c0_7] : memref<120x32xbf16, #tpu.memory_space<vmem>>, vector<120x32xbf16>
    %cst = arith.constant dense<0.000000e+00> : vector<8x32xf32>
    %8 = tpu.matmul %6, %7, %cst {dimension_numbers = #tpu.dot_dimension_numbers<[1], [0], [0], [1], [0, 0, 1, 1], [], []>} : vector<8x120xbf16>, vector<120x32xbf16>, vector<8x32xf32> -> vector<8x32xf32>
    %c0_8 = arith.constant 0 : index
    %c0_9 = arith.constant 0 : index
    %9 = vector.load %arg3[%c0_8, %c0_9] : memref<1x32xf32, #tpu.memory_space<vmem>>, vector<1x32xf32>
    %10 = vector.broadcast %9 : vector<1x32xf32> to vector<8x32xf32>
    %11 = arith.addf %8, %10 : vector<8x32xf32>
    %cst_10 = arith.constant 0.000000e+00 : f32
    %12 = vector.broadcast %cst_10 : f32 to vector<8x32xf32>
    %13 = arith.maximumf %11, %12 : vector<8x32xf32>
    %14 = arith.truncf %13 : vector<8x32xf32> to vector<8x32xbf16>
    %cst_11 = arith.constant 0.000000e+00 : bf16
    %15 = vector.broadcast %cst_11 : bf16 to vector<1x32xbf16>
    %16 = vector.extract_strided_slice %14 {offsets = [0, 0], sizes = [7, 32], strides = [1, 1]} : vector<8x32xbf16> to vector<7x32xbf16>
    %17 = tpu.concatenate %15, %16 in 0 : vector<1x32xbf16>, vector<7x32xbf16> -> vector<8x32xbf16>
    %18 = vector.extract_strided_slice %14 {offsets = [1, 0], sizes = [7, 32], strides = [1, 1]} : vector<8x32xbf16> to vector<7x32xbf16>
    %19 = tpu.concatenate %18, %15 in 0 : vector<7x32xbf16>, vector<1x32xbf16> -> vector<8x32xbf16>
    %20 = tpu.concatenate %17, %14, %19 in 1 : vector<8x32xbf16>, vector<8x32xbf16>, vector<8x32xbf16> -> vector<8x96xbf16>
    %c0_12 = arith.constant 0 : index
    %c0_13 = arith.constant 0 : index
    %21 = vector.load %arg4[%c0_12, %c0_13] : memref<96x64xbf16, #tpu.memory_space<vmem>>, vector<96x64xbf16>
    %cst_14 = arith.constant dense<0.000000e+00> : vector<8x64xf32>
    %22 = tpu.matmul %20, %21, %cst_14 {dimension_numbers = #tpu.dot_dimension_numbers<[1], [0], [0], [1], [0, 0, 1, 1], [], []>} : vector<8x96xbf16>, vector<96x64xbf16>, vector<8x64xf32> -> vector<8x64xf32>
    %c0_15 = arith.constant 0 : index
    %c0_16 = arith.constant 0 : index
    %23 = vector.load %arg5[%c0_15, %c0_16] : memref<1x64xf32, #tpu.memory_space<vmem>>, vector<1x64xf32>
    %24 = vector.broadcast %23 : vector<1x64xf32> to vector<8x64xf32>
    %25 = arith.addf %22, %24 : vector<8x64xf32>
    %cst_17 = arith.constant 0.000000e+00 : f32
    %26 = vector.broadcast %cst_17 : f32 to vector<8x64xf32>
    %27 = arith.maximumf %25, %26 : vector<8x64xf32>
    %c0_18 = arith.constant 0 : index
    %c0_19 = arith.constant 0 : index
    %c0_20 = arith.constant 0 : index
    %28 = vector.load %arg6[%c0_18, %c0_19, %c0_20] : memref<1x8x64xf32, #tpu.memory_space<vmem>>, vector<1x8x64xf32>
    %29 = vector.shape_cast %28 : vector<1x8x64xf32> to vector<8x64xf32>
    %30 = vector.shape_cast %27 : vector<8x64xf32> to vector<1x8x64xf32>
    tpu.vector_store %arg6[%c0_18, %c0_19, %c0_20], %30 {strides = array<i32>} : memref<1x8x64xf32, #tpu.memory_space<vmem>>, vector<1x8x64xf32>,
    return
  }
  func.func @transform_0(%arg0: i32) -> (i32, i32, i32) {
    %c0_i32 = arith.constant 0 : i32
    %c0_i32_0 = arith.constant 0 : i32
    %c0_i32_1 = arith.constant 0 : i32
    return %arg0, %c0_i32, %c0_i32_0 : i32, i32, i32
  }
  func.func @transform_1(%arg0: i32) -> (i32, i32) {
    %c0_i32 = arith.constant 0 : i32
    %c0_i32_0 = arith.constant 0 : i32
    %c0_i32_1 = arith.constant 0 : i32
    return %c0_i32, %c0_i32_0 : i32, i32
  }
  func.func @transform_2(%arg0: i32) -> (i32, i32) {
    %c0_i32 = arith.constant 0 : i32
    %c0_i32_0 = arith.constant 0 : i32
    %c0_i32_1 = arith.constant 0 : i32
    return %c0_i32, %c0_i32_0 : i32, i32
  }
  func.func @transform_3(%arg0: i32) -> (i32, i32) {
    %c0_i32 = arith.constant 0 : i32
    %c0_i32_0 = arith.constant 0 : i32
    %c0_i32_1 = arith.constant 0 : i32
    return %c0_i32, %c0_i32_0 : i32, i32
  }
  func.func @transform_4(%arg0: i32) -> (i32, i32) {
    %c0_i32 = arith.constant 0 : i32
    %c0_i32_0 = arith.constant 0 : i32
    %c0_i32_1 = arith.constant 0 : i32
    return %c0_i32, %c0_i32_0 : i32, i32
  }
  func.func @transform_5(%arg0: i32) -> (i32, i32, i32) {
    %c0_i32 = arith.constant 0 : i32
    %c0_i32_0 = arith.constant 0 : i32
    %c0_i32_1 = arith.constant 0 : i32
    return %arg0, %c0_i32, %c0_i32_0 : i32, i32, i32
  }
}

</mosaic_0001>

<bundles_post_ra>
// kernel: tile.10
= control target key start
LH: loop header
LB: loop body
LE: loop exit
PB: predicated region body
PF: predicated region fallthrough
CT: control target
= control target key end

     0   :  { %s22_s0 = inlined_call_operand.vmem [shape: f32[4], index: 0, kind: input, shape index: {}]   ;;  %s23_s1 = inlined_call_operand.vmem [shape: f32[8,4], index: 1, kind: output, shape index: {}]  }
   0x1   :  { %v4_v0 = vld [vmem:[%s22_s0] ss:$0 sm:$0xff] }
   0x2   :  { %5 = vst [vmem:[%s23_s1] sm:$0xff] %v4_v0 }

// kernel: tile.11
= control target key start
LH: loop header
LB: loop body
LE: loop exit
PB: predicated region body
PF: predicated region fallthrough
CT: control target
= control target key end

     0   :  { %s67_s10 = smov 28   ;;  %s68_s11 = smov 20   ;;  %vm3_vm0 = vcmask 31744   ;;  %vm9_vm1 = vcmask 261344   ;;  %vm15_vm2 = vcmask 228544   ;;  %vm21_vm3 = vcmask 195744   ;;  %s111_s0 = inlined_call_operand.vmem [shape: f32[8,4], index: 0, kind: input, shape index: {}]   ;;  %s112_s1 = inlined_call_operand.vmem [shape: f32[1,32], index: 1, kind: output, shape index: {}]  }
   0x1   :  { %v53_v0 = vld [vmem:[%s111_s0 + $0x7] sm:$0x1]   ;;  %v55_v1 = vld [vmem:[%s111_s0 + $0x5] sm:$0x1]   ;;  %v54_v2 = vld [vmem:[%s111_s0 + $0x6] sm:$0x1]  }
   0x2   :  { %7 = vrot.lane.b32.xlu0 %v53_v0, %s67_s10  ;;  %19 = vrot.lane.b32.xlu1 %v55_v1, %s68_s11  ;;  %v56_v3 = vld [vmem:[%s111_s0 + $0x4] sm:$0x1]   ;;  %v2_v4 = vld [vmem:[%s111_s0] sm:$0x1]   ;;  %s69_s18 = smov 24   ;;  %s70_s19 = smov 16  }
   0x3   :  { %4 = vst.msk [vmem:[#allocation0] sm:$0x1] %vm3_vm0, %v2_v4   ;;  %v57_v5 = vld [vmem:[%s111_s0 + $0x3] sm:$0x1]   ;;  %v58_v6 = vld [vmem:[%s111_s0 + $0x2] sm:$0x1]  }
   0x4   :  { %s71_s24 = smov 12   ;;  %s72_s25 = smov 8   ;;  %v59_v7 = vld [vmem:[%s111_s0 + $0x1] sm:$0x1]   ;;  %vm27_vm4 = vcmask 162944   ;;  %vm33_vm5 = vcmask 130144  }
   0x5   :  { %s73_s0 = smov 4   ;;  %vm39_vm6 = vcmask 97344   ;;  %vm45_vm7 = vcmask 64544  }
   0x6   :  { %13 = vrot.lane.b32.xlu0 %v54_v2, %s69_s18  ;;  %25 = vrot.lane.b32.xlu1 %v56_v3, %s70_s19 }
   0xa   :  { %31 = vrot.lane.b32.xlu0 %v57_v5, %s71_s24  ;;  %37 = vrot.lane.b32.xlu1 %v58_v6, %s72_s25 }
   0xe   :  { %43 = vrot.lane.b32.xlu0 %v59_v7, %s73_s0 }
  0x74   :  { %v8_v8 = vpop.permute.xlu0 %7   ;;  %v20_v9 = vpop.permute.xlu1 %19  }
  0x75   :  { %10 = vst.msk [vmem:[#allocation0] sm:$0x1] %vm9_vm1, %v8_v8  }
  0x78   :  { %v14_v10 = vpop.permute.xlu0 %13   ;;  %v26_v11 = vpop.permute.xlu1 %25  }
  0x79   :  { %16 = vst.msk [vmem:[#allocation0] sm:$0x1] %vm15_vm2, %v14_v10  }
  0x7a   :  { %22 = vst.msk [vmem:[#allocation0] sm:$0x1] %vm21_vm3, %v20_v9  }
  0x7b   :  { %28 = vst.msk [vmem:[#allocation0] sm:$0x1] %vm27_vm4, %v26_v11  }
  0x7c   :  { %v32_v12 = vpop.permute.xlu0 %31   ;;  %v38_v13 = vpop.permute.xlu1 %37  }
  0x7d   :  { %34 = vst.msk [vmem:[#allocation0] sm:$0x1] %vm33_vm5, %v32_v12  }
  0x7e   :  { %40 = vst.msk [vmem:[#allocation0] sm:$0x1] %vm39_vm6, %v38_v13  }
  0x80   :  { %v44_v14 = vpop.permute.xlu0 %43  }
  0x81   :  { %46 = vst.msk [vmem:[#allocation0] sm:$0x1] %vm45_vm7, %v44_v14  }
  0x88   :  { %v50_v15 = vld [vmem:[#allocation0] sm:$0x1] }
  0x89   :  { %52 = vst [vmem:[%s112_s1] sm:$0x1] %v50_v15 }

// kernel: tile.14
= control target key start
LH: loop header
LB: loop body
LE: loop exit
PB: predicated region body
PF: predicated region fallthrough
CT: control target
= control target key end

     0   :  { %s22_s0 = inlined_call_operand.vmem [shape: f32[8], index: 0, kind: input, shape index: {}]   ;;  %s23_s1 = inlined_call_operand.vmem [shape: f32[8,8], index: 1, kind: output, shape index: {}]  }
   0x1   :  { %v4_v0 = vld [vmem:[%s22_s0] ss:$0 sm:$0xff] }
   0x2   :  { %5 = vst [vmem:[%s23_s1] sm:$0xff] %v4_v0 }

// kernel: tile.15
= control target key start
LH: loop header
LB: loop body
LE: loop exit
PB: predicated region body
PF: predicated region fallthrough
CT: control target
= control target key end

     0   :  { %s67_s10 = smov 56   ;;  %s68_s11 = smov 40   ;;  %vm3_vm0 = vcmask 64512   ;;  %vm9_vm1 = vcmask 523712   ;;  %vm15_vm2 = vcmask 458112   ;;  %vm21_vm3 = vcmask 392512   ;;  %s111_s0 = inlined_call_operand.vmem [shape: f32[8,8], index: 0, kind: input, shape index: {}]   ;;  %s112_s1 = inlined_call_operand.vmem [shape: f32[1,64], index: 1, kind: output, shape index: {}]  }
   0x1   :  { %v53_v0 = vld [vmem:[%s111_s0 + $0x7] sm:$0x1]   ;;  %v55_v1 = vld [vmem:[%s111_s0 + $0x5] sm:$0x1]   ;;  %v54_v2 = vld [vmem:[%s111_s0 + $0x6] sm:$0x1]  }
   0x2   :  { %7 = vrot.lane.b32.xlu0 %v53_v0, %s67_s10  ;;  %19 = vrot.lane.b32.xlu1 %v55_v1, %s68_s11  ;;  %v56_v3 = vld [vmem:[%s111_s0 + $0x4] sm:$0x1]   ;;  %v2_v4 = vld [vmem:[%s111_s0] sm:$0x1]   ;;  %s69_s18 = smov 48   ;;  %s70_s19 = smov 32  }
   0x3   :  { %4 = vst.msk [vmem:[#allocation0] sm:$0x1] %vm3_vm0, %v2_v4   ;;  %v57_v5 = vld [vmem:[%s111_s0 + $0x3] sm:$0x1]   ;;  %v58_v6 = vld [vmem:[%s111_s0 + $0x2] sm:$0x1]  }
   0x4   :  { %s71_s24 = smov 24   ;;  %s72_s25 = smov 16   ;;  %v59_v7 = vld [vmem:[%s111_s0 + $0x1] sm:$0x1]   ;;  %vm27_vm4 = vcmask 326912   ;;  %vm33_vm5 = vcmask 261312  }
   0x5   :  { %s73_s0 = smov 8   ;;  %vm39_vm6 = vcmask 195712   ;;  %vm45_vm7 = vcmask 130112  }
   0x6   :  { %13 = vrot.lane.b32.xlu0 %v54_v2, %s69_s18  ;;  %25 = vrot.lane.b32.xlu1 %v56_v3, %s70_s19 }
   0xa   :  { %31 = vrot.lane.b32.xlu0 %v57_v5, %s71_s24  ;;  %37 = vrot.lane.b32.xlu1 %v58_v6, %s72_s25 }
   0xe   :  { %43 = vrot.lane.b32.xlu0 %v59_v7, %s73_s0 }
  0x74   :  { %v8_v8 = vpop.permute.xlu0 %7   ;;  %v20_v9 = vpop.permute.xlu1 %19  }
  0x75   :  { %10 = vst.msk [vmem:[#allocation0] sm:$0x1] %vm9_vm1, %v8_v8  }
  0x78   :  { %v14_v10 = vpop.permute.xlu0 %13   ;;  %v26_v11 = vpop.permute.xlu1 %25  }
  0x79   :  { %16 = vst.msk [vmem:[#allocation0] sm:$0x1] %vm15_vm2, %v14_v10  }
  0x7a   :  { %22 = vst.msk [vmem:[#allocation0] sm:$0x1] %vm21_vm3, %v20_v9  }
  0x7b   :  { %28 = vst.msk [vmem:[#allocation0] sm:$0x1] %vm27_vm4, %v26_v11  }
  0x7c   :  { %v32_v12 = vpop.permute.xlu0 %31   ;;  %v38_v13 = vpop.permute.xlu1 %37  }
  0x7d   :  { %34 = vst.msk [vmem:[#allocation0] sm:$0x1] %vm33_vm5, %v32_v12  }
  0x7e   :  { %40 = vst.msk [vmem:[#allocation0] sm:$0x1] %vm39_vm6, %v38_v13  }
  0x80   :  { %v44_v14 = vpop.permute.xlu0 %43  }
  0x81   :  { %46 = vst.msk [vmem:[#allocation0] sm:$0x1] %vm45_vm7, %v44_v14  }
  0x88   :  { %v50_v15 = vld [vmem:[#allocation0] sm:$0x1] }
  0x89   :  { %52 = vst [vmem:[%s112_s1] sm:$0x1] %v50_v15 }

// kernel: encoder_forward.1
= control target key start
LH: loop header
LB: loop body
LE: loop exit
PB: predicated region body
PF: predicated region fallthrough
CT: control target
= control target key end

     0   :  { %s712_s18 = smov 0   ;;  %s802_s0 = inlined_call_operand.vmem [shape: bf16[2,10,40], index: 0, kind: input, shape index: {}]   ;;  %s803_s1 = inlined_call_operand.vmem [shape: bf16[120,32], index: 1, kind: input, shape index: {}]   ;;  %s804_s2 = inlined_call_operand.vmem [shape: f32[1,32], index: 2, kind: input, shape index: {}]   ;;  %s805_s3 = inlined_call_operand.vmem [shape: bf16[96,64], index: 3, kind: input, shape index: {}]   ;;  %s806_s4 = inlined_call_operand.vmem [shape: f32[1,64], index: 4, kind: input, shape index: {}]   ;;  %s807_s5 = inlined_call_operand.vmem [shape: f32[2,8,64], index: 5, kind: output, shape index: {}]  }
   0x1 LB: > { %s555_s19 = sadd.s32 4294967295, %s674_s18   ;;  %p559_p0 = scmp.ge.s32.totalorder %s674_s18, 1  ;;  %s674_s18 = sphi %s712_s18, %s15_s18  }
   0x2   : > { %p187_p1 = scmp.lt.s32.totalorder %s674_s18, 3 }
   0x4   : > { %p188_p2 = pnand %p559_p0, %p187_p1 }
   0x5   : > { %p214_p3 = scmp.lt.s32.totalorder (!%p188_p2), %s555_s19, 1  ;;  %v654_v0 = vld [vmem:[%s803_s1] sm:$0xff] (!%p188_p2)   ;;  %v676_v1 = vmov (!%p188_p2), 0.0   ;;  %v655_v2 = vld [vmem:[%s803_s1 + $0x8] sm:$0xff] (!%p188_p2)   ;;  %v656_v5 = vld [vmem:[%s803_s1 + $0x10] sm:$0xff] (!%p188_p2)   ;;  %vm677_vm0 = vmmov (!%p188_p2), 0  }
   0x6   : > { %191 = sbr.rel (%p188_p2) target bundleno = 703 (0x2bf), region = 40  ;;  %602 = vmatprep.subr.bf16.mxu0 (!%p188_p2), %v676_v1  ;;  %622 = vmatprep.subr.bf16.mxu1 (!%p188_p2), %v676_v1  ;;  %v657_v10 = vld [vmem:[%s803_s1 + $0x18] sm:$0xff] (!%p188_p2)   ;;  %v658_v14 = vld [vmem:[%s803_s1 + $0x20] sm:$0xff] (!%p188_p2)   ;;  %s678_s9 = smov (!%p188_p2), 40   ;;  %v659_v16 = vld [vmem:[%s803_s1 + $0x28] sm:$0xff] (!%p188_p2)   ;;  %vm324_vm1 = vcmask (!%p188_p2), 1043456  }
   0x7   : > { %603 = vmatpush3.bf16.msra.mxu0 (!%p188_p2), %v654_v0  ;;  %618 = vmatprep.mubr.msk.bf16.mxu0 (!%p188_p2), %vm677_vm0, %v676_v1  ;;  %s679_s12 = smov (!%p188_p2), 80   ;;  %v660_v17 = vld [vmem:[%s803_s1 + $0x30] sm:$0xff] (!%p188_p2)   ;;  %v661_v18 = vld [vmem:[%s803_s1 + $0x38] ss:$0 sps:$4 sm:$0xff] (!%p188_p2)   ;;  %vm247_vm2 = vcmask (!%p188_p2), 326656   ;;  %vm251_vm3 = vcmask (!%p188_p2), 654336  }
   0x8   : > { %604 = vmatprep.subr.bf16.mxu0 (!%p188_p2), %v676_v1  ;;  %634 = vmatprep.mubr.msk.bf16.mxu1 (!%p188_p2), %vm677_vm0, %v676_v1  ;;  %v326_v19 = vsel (!%p188_p2), %vm324_vm1, %v661_v18, 0  ;;  %vm321_vm4 = vcmask (!%p188_p2), 982016   ;;  %v662_v24 = vld [vmem:[%s805_s3] sm:$0xff] (!%p188_p2)   ;;  %v663_v25 = vld [vmem:[%s805_s3 + $0x8] sm:$0xff] (!%p188_p2)   ;;  %v664_v26 = vld [vmem:[%s805_s3 + $0x10] sm:$0xff] (!%p188_p2)   ;;  %s681_s10 = smov (!%p188_p2), 64  }
   0x9   : > { %623 = vmatpush3.bf16.msra.mxu1 (!%p188_p2), %v662_v24  ;;  %v665_v27 = vld [vmem:[%s805_s3 + $0x18] sm:$0xff] (!%p188_p2)   ;;  %v666_v28 = vld [vmem:[%s805_s3 + $0x20] sm:$0xff] (!%p188_p2)   ;;  %v667_v29 = vld [vmem:[%s805_s3 + $0x28] sm:$0xff] (!%p188_p2)   ;;  %vm386_vm5 = vsmask.f32 (!%p188_p2), 3328  ;;  %vm378_vm7 = vcmask (!%p188_p2), 1040384  }
   0xa   : > { %624 = vmatprep.subr.bf16.mxu1 (!%p188_p2), %v676_v1  ;;  %v565_v30 = vld [vmem:[%s804_s2] ss:$0 sm:$0xff] (!%p188_p2)  ;;  %vm387_vm6 = vmand (!%p188_p2), %vm324_vm1, %vm386_vm5  ;;  %vm379_vm8 = vsmask.f32 (!%p188_p2), 256  ;;  %vm395_vm10 = vcmask (!%p188_p2), 261120   ;;  %vm399_vm11 = vcmask (!%p188_p2), 523264  }
   0xb   : > { %605 = vmatpush3.bf16.msra.mxu0 (!%p188_p2), %v655_v2  ;;  %vm380_vm9 = vmand (!%p188_p2), %vm378_vm7, %vm379_vm8  ;;  %vm457_vm12 = vcmask (!%p188_p2), 785408   ;;  %v575_v50 = vld [vmem:[%s806_s4] ss:$0 sm:$0xff] (!%p188_p2) }
   0xc   : > { %606 = vmatprep.subr.bf16.mxu0 (!%p188_p2), %v676_v1 }
   0xd   : > { %s809_s19 = smov (!%p214_p3, %s555_s19), 1  ;;  %625 = vmatpush3.bf16.msra.mxu1 %v663_v25 }
   0xe   : > { %s585_s24 = sshll.u32 %s809_s19, 3  ;;  %626 = vmatprep.subr.bf16.mxu1 %v676_v1 }
   0xf   : > { %s218_s27 = scalar_lea.vmem %s802_s0, %s585_s24  ;;  %607 = vmatpush3.bf16.msra.mxu0 %v656_v5  ;;  %s222_s15 = scalar_lea.vmem %s807_s5, %s585_s24 }
  0x10   : > { %v224_v3 = vld [vmem:[%s218_s27] sm:$0xf]  ;;  %v225_v4 = vld [vmem:[%s218_s27 + $0x4] sm:$0x1]  ;;  %608 = vmatprep.subr.bf16.mxu0 %v676_v1 }
  0x11   : > { %v563_v6 = vcombine.low %v224_v3, %v225_v4  ;;  %v226_v7 = vld [vmem:[%s218_s27] sm:$0xe]  ;;  %627 = vmatpush3.bf16.msra.mxu1 %v664_v26 }
  0x12   : > { %v564_v12 = vcombine.low %v226_v7, %v225_v4  ;;  %628 = vmatprep.subr.bf16.mxu1 %v676_v1 }
  0x13   : > { %v233_v8 = vshrl.u32 %v563_v6, 16  ;;  %v235_v9 = vshll.u32 %v563_v6, 16  ;;  %609 = vmatpush3.bf16.msra.mxu0 %v657_v10 }
  0x14   : > { %v244_v15 = vrot.slane %v564_v12, 1  ;;  %610 = vmatprep.subr.bf16.mxu0 %v676_v1 }
  0x15   : > { %v237_v11 = vrot.slane %v235_v9, 1  ;;  %629 = vmatpush3.bf16.msra.mxu1 %v665_v27 }
  0x16   : > { %630 = vmatprep.subr.bf16.mxu1 %v676_v1 }
  0x17   : > { %v238_v13 = vor.u32 %v237_v11, %v233_v8  ;;  %611 = vmatpush3.bf16.msra.mxu0 %v658_v14 }
  0x18   : > { %612 = vmatprep.subr.bf16.mxu0 %v676_v1 }
  0x19   : > { %239 = vrot.lane.b32.xlu0 %v238_v13, %s678_s9  ;;  %631 = vmatpush3.bf16.msra.mxu1 %v666_v28  ;;  %s680_s9 = smov 32  }
  0x1a   : > { %632 = vmatprep.subr.bf16.mxu1 %v676_v1 }
  0x1b   : > { %613 = vmatpush3.bf16.msra.mxu0 %v659_v16 }
  0x1c   : > { %614 = vmatprep.subr.bf16.mxu0 %v676_v1 }
  0x1d   : > { %245 = vrot.lane.b32.xlu0 %v244_v15, %s679_s12  ;;  %633 = vmatpush3.bf16.msra.mxu1 %v667_v29 }
  0x1f   : > { %615 = vmatpush3.bf16.msra.mxu0 %v660_v17 }
  0x20   : > { %616 = vmatprep.subr.bf16.mxu0 %v676_v1 }
  0x23   : > { %617 = vmatpush3.bf16.msra.mxu0 %v326_v19 }
  0x8b   : > { %v240_v20 = vpop.permute.xlu0 %239 }
  0x8c   : > { %v250_v21 = vsel %vm247_vm2, %v224_v3, %v240_v20 }
  0x8f   : > { %v246_v22 = vpop.permute.xlu0 %245 }
  0x90   : > { %v253_v23 = vsel %vm251_vm3, %v250_v21, %v246_v22 }
  0x91   : > { %619 = vmatmul.mubr.msk.bf16.vlgmr.msra.gmra.mrb[0].mxu0 %vm321_vm4, %v253_v23 }
 0x164   : > { %v362_v31 = vpop.f32.mrb[0].mxu0 }
 0x165   : > { %v363_v32 = vadd.f32 %v565_v30, %v362_v31  ;;  %v620_v33 = vpop.f32.mrb[1].mxu0 }
 0x166   : > { %v365_v34 = vpop.f32.mrb[2].mxu0 }
 0x167   : > { %v368_v35 = vmax.f32 %v363_v32, 0.0  ;;  %v621_v36 = vpop.f32.mrb[3].mxu0 }
 0x169   : > { %v369_v37 = vpack.c.bf16 %v368_v35, %v368_v35 }
 0x16b   : > { %v374_v38 = vshll.u32 %v369_v37, 16  ;;  %390 = vrot.lane.b32.xlu1 %v369_v37, %s680_s9  ;;  %v371_v39 = vshrl.u32 %v369_v37, 16 }
 0x16d   : > { %v382_v40 = vrot.slane %v374_v38, 1  ;;  %v373_v41 = vrot.slane %v371_v39, 7 }
 0x16f   : > { %v383_v42 = vor.u32 %v382_v40, %v371_v39  ;;  %v376_v43 = vor.u32 %v374_v38, %v373_v41 }
 0x171   : > { %v388_v44 = vsel %vm387_vm6, %v383_v42, 0  ;;  %v381_v46 = vsel %vm380_vm9, 0, %v376_v43 }
 0x172   : > { %393 = vrot.lane.b32.xlu1 %v388_v44, %s681_s10 }
 0x1dd   : > { %v391_v45 = vpop.permute.xlu1 %390 }
 0x1de   : > { %v398_v47 = vsel %vm395_vm10, %v381_v46, %v391_v45 }
 0x1e4   : > { %v394_v48 = vpop.permute.xlu1 %393 }
 0x1e5   : > { %v401_v49 = vsel %vm399_vm11, %v398_v47, %v394_v48 }
 0x1e6   : > { %635 = vmatmul.mubr.msk.bf16.vlgmr.msra.gmra.mrb[0].mxu1 %vm457_vm12, %v401_v49 }
 0x2b9   : > { %v494_v51 = vpop.f32.mrb[0].mxu1 }
 0x2ba   : > { %v495_v52 = vadd.f32 %v575_v50, %v494_v51  ;;  %v636_v53 = vpop.f32.mrb[1].mxu1 }
 0x2bb   : > { %v497_v54 = vpop.f32.mrb[2].mxu1 }
 0x2bc   : > { %v500_v55 = vmax.f32 %v495_v52, 0.0  ;;  %v637_v56 = vpop.f32.mrb[3].mxu1 }
 0x2be   : > { %501 = vst.msk [vmem:[%s222_s15] sm:$0xff] %vm399_vm11, %v500_v55 }
 0x2bf PF: > { %s15_s18 = sadd.s32 1, %s674_s18  }
 0x2c0   : > { %p12_p4 = scmp.ge.s32.totalorder %s15_s18, 4  }
 0x2c2   :  { %14 = sbr.rel (!%p12_p4) target bundleno = 1 (0x1), region = 70 }

</bundles_post_ra>
